<compile_context>
chip_gen: v7x
topology: tpu7x:2x2x1
jax: 0.10.0
libtpu: 0.0.40
codegen_flags: <defaults>
</compile_context>

<pallas_src>
import functools

import jax
import jax.numpy as jnp
from jax.experimental import pallas as pl
from jax.experimental.pallas import tpu as pltpu

_LANES = 128
_SUBLANES = 8


def _round_up(a, b):
    return ((a + b - 1) // b) * b


def _vmem_budget_bytes():
    """Generation-aware VMEM budget (~70% of physical; conservative fallback)."""
    cap = None
    try:
        cap = getattr(pltpu.get_tpu_info(), "vmem_capacity_bytes", None)
    except Exception:
        cap = None
    if not cap:
        cap = 64 << 20  # v7x has the smallest VMEM; safe everywhere
    return int(cap * 0.70)


def _default_num_splits():
    """Split rows across TensorCores only on dual-TC chips (v7x)."""
    try:
        kind = jax.devices()[0].device_kind.lower()
        if "v7" in kind:
            return 2
    except Exception:
        pass
    return 1


def _mse_sum_kernel(x_ref, t_ref, acc_ref, *, rows, row_tile, steps_per_split,
                    needs_mask):
    """Accumulate per-lane partial sums of (x - t)^2 into a (1, 8, 128) block."""
    c = pl.program_id(0)
    i = pl.program_id(1)

    @pl.when(i == 0)
    def _():
        acc_ref[...] = jnp.zeros_like(acc_ref)

    x = x_ref[...].astype(jnp.float32)
    t = t_ref[...].astype(jnp.float32)
    d = x - t
    sq = d * d

    if needs_mask:  # static: only emitted when the tiling is ragged
        blk = c * steps_per_split + i
        row0 = blk * row_tile
        row_ids = row0 + jax.lax.broadcasted_iota(
            jnp.int32, (row_tile, _LANES), 0)
        sq = jnp.where(row_ids < rows, sq, 0.0)

    # (row_tile, 128) -> (row_tile//8, 8, 128) -> (8, 128): VPU adds only,
    # no cross-lane/sublane reduce in the hot loop (hidden under HBM stream).
    psum = sq.reshape(-1, _SUBLANES, _LANES).sum(axis=0)
    acc_ref[...] += psum[None, :, :]


def _mse_loss_impl(x, target, row_tile, num_splits, min_pallas_elems):
    n_elems = x.size
    rows = n_elems // _LANES

    use_pallas = (
        n_elems >= max(min_pallas_elems, _SUBLANES * _LANES)
        and n_elems % _LANES == 0
        and rows >= _SUBLANES
    )
    if not use_pallas:
        # TODO(synk): tiny or non-128-divisible activations use XLA's fused
        # reduce (already at roofline; pallas_call fixed cost would dominate).
        d = x.astype(jnp.float32) - target.astype(jnp.float32)
        return jnp.mean(d * d)

    if num_splits is None:
        num_splits = _default_num_splits()
    num_splits = max(1, int(num_splits))

    itemsize = jnp.dtype(x.dtype).itemsize
    if row_tile is None:
        # ~4 MiB per input per pipeline buffer regardless of dtype.
        row_tile = 8192 * max(1, 4 // itemsize)

    vmem_budget = _vmem_budget_bytes()
    # Per-row VMEM cost: 2 inputs x 2 pipeline buffers in input dtype plus a
    # few rows of f32 intermediates the compiler may materialize in the body.
    per_row_bytes = 2 * 2 * _LANES * itemsize + 4 * _LANES * 4
    max_rows = max(_SUBLANES,
                   (vmem_budget // per_row_bytes) // _SUBLANES * _SUBLANES)

    row_tile_eff = min(int(row_tile), max_rows,
                       _round_up(pl.cdiv(rows, num_splits), _SUBLANES))
    row_tile_eff = max(_SUBLANES, _round_up(row_tile_eff, _SUBLANES))

    total_steps = pl.cdiv(rows, row_tile_eff)
    num_splits = min(num_splits, total_steps)
    steps_per_split = pl.cdiv(total_steps, num_splits)

    needs_mask = (rows % row_tile_eff != 0) or (
        num_splits * steps_per_split != total_steps)

    # Flatten is a metadata-only reshape (no HBM copy): traffic stays 2N reads.
    xf = x.reshape(rows, _LANES)
    tf = target.reshape(rows, _LANES)

    if num_splits * steps_per_split == total_steps:
        def in_map(c, i):
            return (c * steps_per_split + i, 0)
    else:
        last_blk = total_steps - 1

        def in_map(c, i):
            # Extra grid points (num_splits not dividing total_steps) re-read
            # the last valid block; the kernel masks their contribution to 0.
            return (jnp.minimum(c * steps_per_split + i, last_blk), 0)

    kernel = functools.partial(
        _mse_sum_kernel, rows=rows, row_tile=row_tile_eff,
        steps_per_split=steps_per_split, needs_mask=needs_mask)

    partial_sums = pl.pallas_call(
        kernel,
        out_shape=jax.ShapeDtypeStruct(
            (num_splits, _SUBLANES, _LANES), jnp.float32),
        grid_spec=pltpu.PrefetchScalarGridSpec(
            num_scalar_prefetch=0,
            grid=(num_splits, steps_per_split),
            in_specs=[
                pl.BlockSpec((row_tile_eff, _LANES), in_map),
                pl.BlockSpec((row_tile_eff, _LANES), in_map),
            ],
            out_specs=pl.BlockSpec(
                (1, _SUBLANES, _LANES), lambda c, i: (c, 0, 0)),
        ),
        compiler_params=pltpu.CompilerParams(
            # TODO(synk): on v7x verify this shards the leading axis across the
            # two TCs; if serial in the profile, use pltpu.CORE_PARALLEL.
            dimension_semantics=("parallel", "arbitrary"),
            vmem_limit_bytes=vmem_budget,
        ),
    )(xf, tf)

    # Finalize outside the kernel: one cross-lane reduce + scalar divide.
    return jnp.sum(partial_sums) / jnp.float32(n_elems)


@functools.partial(jax.custom_vjp, nondiff_argnums=(2, 3, 4))
def _mse_loss(x, target, row_tile, num_splits, min_pallas_elems):
    return _mse_loss_impl(x, target, row_tile, num_splits, min_pallas_elems)


def _mse_loss_fwd(x, target, row_tile, num_splits, min_pallas_elems):
    loss = _mse_loss_impl(x, target, row_tile, num_splits, min_pallas_elems)
    return loss, (x, target)


def _mse_loss_bwd(row_tile, num_splits, min_pallas_elems, res, g):
    x, target = res
    diff = x.astype(jnp.float32) - target.astype(jnp.float32)
    gx = (2.0 * g / jnp.float32(x.size)) * diff
    # target is `target.detach()` in the PyTorch module: no gradient to it.
    return gx.astype(x.dtype), jnp.zeros_like(target)


_mse_loss.defvjp(_mse_loss_fwd, _mse_loss_bwd)


def content_loss(x, target, *, row_tile=None, num_splits=None,
                 min_pallas_elems=1 << 20):
    """ContentLoss.forward: returns (input passthrough, mse(input, target))."""
    assert x.shape == target.shape, (x.shape, target.shape)
    loss = _mse_loss(x, target, row_tile, num_splits, min_pallas_elems)
    return x, loss


def make_content_loss(target, **kwargs):
    """Factory mirroring ContentLoss(target): captures the detached target once."""
    target = jax.lax.stop_gradient(target)

    def forward(x):
        return content_loss(x, target, **kwargs)

    return forward


if __name__ == "__main__":
    key = jax.random.PRNGKey(0)
    k1, k2, k3, k4 = jax.random.split(key, 4)

    def ref_mse(a, b):
        return jnp.mean((a.astype(jnp.float32) - b.astype(jnp.float32)) ** 2)

    # 1) Default path at a small NST-like activation shape (JAX fast path).
    x = jax.random.normal(k1, (2, 4, 16, 16), dtype=jnp.float32)
    target = jax.random.normal(k2, (2, 4, 16, 16), dtype=jnp.float32)
    out, loss = content_loss(x, target)
    out = jax.block_until_ready(out)
    loss = jax.block_until_ready(loss)
    assert jnp.allclose(out, x), "forward must return input unchanged"
    assert jnp.allclose(loss, ref_mse(x, target), rtol=1e-6, atol=1e-6)

    # 2) Force the Pallas kernel: evenly tiled rows (no masking path).
    _, loss2 = content_loss(x, target, row_tile=8, num_splits=1,
                            min_pallas_elems=0)
    loss2 = jax.block_until_ready(loss2)
    assert jnp.allclose(loss2, ref_mse(x, target), rtol=1e-6, atol=1e-6), loss2

    # 3) Pallas kernel with a ragged last block (in-kernel masking).
    x3 = jax.random.normal(k3, (2, 6, 16, 16), dtype=jnp.float32)  # 24 rows
    t3 = jax.random.normal(k4, (2, 6, 16, 16), dtype=jnp.float32)
    _, loss3 = content_loss(x3, t3, row_tile=16, num_splits=1,
                            min_pallas_elems=0)
    loss3 = jax.block_until_ready(loss3)
    assert jnp.allclose(loss3, ref_mse(x3, t3), rtol=1e-6, atol=1e-6), loss3

    # 4) Two-way split where the extra grid point is clamped + masked out.
    _, loss4 = content_loss(x3, t3, row_tile=8, num_splits=2,
                            min_pallas_elems=0)
    loss4 = jax.block_until_ready(loss4)
    assert jnp.allclose(loss4, ref_mse(x3, t3), rtol=1e-6, atol=1e-6), loss4

    # 5) Gradient path through custom_vjp: d(loss)/dx = 2*(x - target)/n.
    grad_fn = jax.grad(
        lambda a: content_loss(a, t3, row_tile=16, num_splits=1,
                               min_pallas_elems=0)[1])
    gx = jax.block_until_ready(grad_fn(x3))
    gref = 2.0 * (x3 - t3) / x3.size
    assert jnp.allclose(gx, gref, rtol=1e-5, atol=1e-6)

    print("KERNEL_OK")
</pallas_src>

<mosaic_0001>
module attributes {stable_mosaic.version = 11 : i64} {
  func.func @_mse_sum_kernel(%arg0: i32, %arg1: i32, %arg2: memref<8x128xf32, #tpu.memory_space<vmem>>, %arg3: memref<8x128xf32, #tpu.memory_space<vmem>>, %arg4: memref<1x8x128xf32, #tpu.memory_space<vmem>>) attributes {dimension_semantics = [#tpu.dimension_semantics<parallel>, #tpu.dimension_semantics<arbitrary>], iteration_bounds = array<i64: 1, 2>, scalar_prefetch = 0 : i64, scratch_operands = 0 : i64, tpu.core_type = #tpu.core_type<tc>, window_params = [{transform_indices = @transform_0, window_bounds = array<i64: 8, 128>}, {transform_indices = @transform_1, window_bounds = array<i64: 8, 128>}, {transform_indices = @transform_2, window_bounds = array<i64: 1, 8, 128>}]} {
    %c0_i32 = arith.constant 0 : i32
    %0 = arith.cmpi eq, %arg1, %c0_i32 : i32
    %1 = arith.extui %0 : i1 to i32
    %c0_i32_0 = arith.constant 0 : i32
    %2 = arith.cmpi ne, %1, %c0_i32_0 : i32
    scf.if %2 {
      %cst_10 = arith.constant 0.000000e+00 : f32
      %13 = vector.broadcast %cst_10 : f32 to vector<1x8x128xf32>
      %c0_11 = arith.constant 0 : index
      %c0_12 = arith.constant 0 : index
      %c0_13 = arith.constant 0 : index
      %14 = vector.load %arg4[%c0_11, %c0_12, %c0_13] : memref<1x8x128xf32, #tpu.memory_space<vmem>>, vector<1x8x128xf32>
      tpu.vector_store %arg4[%c0_11, %c0_12, %c0_13], %13 {strides = array<i32>} : memref<1x8x128xf32, #tpu.memory_space<vmem>>, vector<1x8x128xf32>,
    } else {
    }
    %c0 = arith.constant 0 : index
    %c0_1 = arith.constant 0 : index
    %3 = vector.load %arg2[%c0, %c0_1] : memref<8x128xf32, #tpu.memory_space<vmem>>, vector<8x128xf32>
    %c0_2 = arith.constant 0 : index
    %c0_3 = arith.constant 0 : index
    %4 = vector.load %arg3[%c0_2, %c0_3] : memref<8x128xf32, #tpu.memory_space<vmem>>, vector<8x128xf32>
    %5 = arith.subf %3, %4 : vector<8x128xf32>
    %6 = arith.mulf %5, %5 : vector<8x128xf32>
    %7 = vector.shape_cast %6 : vector<8x128xf32> to vector<1x8x128xf32>
    %cst = arith.constant dense<0.000000e+00> : vector<8x128xf32>
    %8 = vector.multi_reduction <add>, %7, %cst [0] : vector<1x8x128xf32> to vector<8x128xf32>
    %c0_4 = arith.constant 0 : index
    %c0_5 = arith.constant 0 : index
    %c0_6 = arith.constant 0 : index
    %9 = vector.load %arg4[%c0_4, %c0_5, %c0_6] : memref<1x8x128xf32, #tpu.memory_space<vmem>>, vector<1x8x128xf32>
    %10 = vector.shape_cast %8 : vector<8x128xf32> to vector<1x8x128xf32>
    %11 = arith.addf %9, %10 : vector<1x8x128xf32>
    %c0_7 = arith.constant 0 : index
    %c0_8 = arith.constant 0 : index
    %c0_9 = arith.constant 0 : index
    %12 = vector.load %arg4[%c0_7, %c0_8, %c0_9] : memref<1x8x128xf32, #tpu.memory_space<vmem>>, vector<1x8x128xf32>
    tpu.vector_store %arg4[%c0_7, %c0_8, %c0_9], %11 {strides = array<i32>} : memref<1x8x128xf32, #tpu.memory_space<vmem>>, vector<1x8x128xf32>,
    return
  }
  func.func @transform_0(%arg0: i32, %arg1: i32) -> (i32, i32) {
    %c2_i32 = arith.constant 2 : i32
    %0 = arith.muli %arg0, %c2_i32 : i32
    %1 = arith.addi %0, %arg1 : i32
    %c0_i32 = arith.constant 0 : i32
    %c0_i32_0 = arith.constant 0 : i32
    return %1, %c0_i32 : i32, i32
  }
  func.func @transform_1(%arg0: i32, %arg1: i32) -> (i32, i32) {
    %c2_i32 = arith.constant 2 : i32
    %0 = arith.muli %arg0, %c2_i32 : i32
    %1 = arith.addi %0, %arg1 : i32
    %c0_i32 = arith.constant 0 : i32
    %c0_i32_0 = arith.constant 0 : i32
    return %1, %c0_i32 : i32, i32
  }
  func.func @transform_2(%arg0: i32, %arg1: i32) -> (i32, i32, i32) {
    %c0_i32 = arith.constant 0 : i32
    %c0_i32_0 = arith.constant 0 : i32
    %c0_i32_1 = arith.constant 0 : i32
    return %arg0, %c0_i32, %c0_i32_0 : i32, i32, i32
  }
}

</mosaic_0001>

<bundles_post_ra>
// kernel: tpu_custom_call.1
= control target key start
LH: loop header
LB: loop body
LE: loop exit
PB: predicated region body
PF: predicated region fallthrough
CT: control target
= control target key end

     0   :  { %7 = vsyncpa [#allocation3], 0  ;;  %s773_s0 = inlined_call_operand.hbm [shape: f32[16,128], index: 0, kind: input, shape index: {}]   ;;  %s774_s1 = inlined_call_operand.hbm [shape: f32[16,128], index: 1, kind: input, shape index: {}]   ;;  %s775_s2 = inlined_call_operand.hbm [shape: f32[1,8,128], index: 2, kind: output, shape index: {}]  }
   0x1   :  { %9 = vsyncpa [#allocation3 + $0x1], 0 }
   0x2   :  { %10 = vsyncpa [#allocation6], 0 }
   0x3   :  { %12 = vsyncpa [#allocation6 + $0x1], 0 }
   0x4   :  { %13 = vsyncpa [#allocation4], 0  ;;  %s575_s9 = smov 0   ;;  %s577_s10 = smov 0  }
   0x5   :  { %s579_s11 = smov 0   ;;  %s581_s12 = smov 0  }
   0x6   :  { %s583_s13 = smov 0   ;;  %s585_s14 = smov 0  }
   0x7 LB: > { %s327_s15 = sadd.s32 4294967295, %s554_s14   ;;  %s28_s16 = sadd.s32 1, %s550_s13  ;;  %s554_s14 = sphi %s585_s14, %s19_s14   ;;  %s550_s13 = sphi %s583_s13, %s790_s13   ;;  %s546_s12 = sphi %s581_s12, %s789_s12   ;;  %s542_s11 = sphi %s579_s11, %s788_s11   ;;  %s538_s10 = sphi %s577_s10, %s787_s10   ;;  %s534_s9 = sphi %s575_s9, %s786_s9  }
   0x8   : > { %p29_p0 = scmp.ge.s32.totalorder %s28_s16, 2  ;;  %s42_s17 = sadd.s32 1, %s542_s11 }
   0x9   : > { %p49_p1 = scmp.ne.s32.totalorder %s542_s11, %s538_s10  ;;  %p50_p2 = scmp.eq.s32.totalorder %s554_s14, 0 }
   0xa   : > { %s792_s16 = smov (%p29_p0, %s28_s16), 0  ;;  %p55_p4 = scmp.ne.s32.totalorder %s538_s10, %s534_s9 }
   0xb   : > { %p611_p3 = por %p50_p2, %p49_p1  ;;  %s39_s19 = ssub.s32 %s550_s13, %s792_s16 }
   0xc   : > { %p56_p5 = scmp.eq.s32.totalorder %s327_s15, 0  ;;  %p40_p6 = scmp.eq.s32.totalorder %s39_s19, 0 }
   0xd   : > { %p357_p8 = scmp.lt.s32.totalorder %s554_s14, 2  ;;  %s629_s22 = sand.u32 1, %s542_s11  }
   0xe   : > { %p620_p7 = por %p56_p5, %p55_p4  ;;  %s331_s23 = sshll.u32 %s550_s13, 7 }
   0xf   : > { %s626_s21 = scalar_select %p40_p6, %s542_s11, %s42_s17  }
  0x10   : > { %s778_s20 = scalar_select %p620_p7, 1, 0 }
  0x11   : > { %s330_s24 = sshll.u32 %s629_s22, 3  ;;  %s638_s27 = scalar_lea.hbm %s773_s0, %s331_s23 }
  0x12   : > { %s139_s28 = scalar_lea.vmem [#allocation2], %s330_s24  ;;  %p644_p9 = pnand %p357_p8, %p611_p3 }
  0x13   : > { %s148_s29 = sshll.u32 %s139_s28, 4  ;;  %s136_s3 = scalar_lea.sflag [#allocation3], %s629_s22  ;;  %s648_s29 = int_to_ptr.vmem [resolvable:$true] %s148_s29 }
  0x14   : > { %s410_s4 = scalar_lea.hbm %s638_s27, 128  ;;  %p412_p13 = pneg %p644_p9 }
  0x15   : > { %p411_p12 = scmp.ne.s32.totalorder %s638_s27, %s410_s4  ;;  %s415_s7 = scalar_lea.hbm %s773_s0, 256 }
  0x16   : > { %p416_p2 = scmp.lt.u32.totalorder %s638_s27, %s773_s0  ;;  %p417_p3 = scmp.lt.u32.totalorder %s415_s7, %s410_s4 }
  0x17   : > { %p413_p0 = pnand %p412_p13, %p411_p12  ;;  %p419_p5 = scmp.lt.u32.totalorder %s410_s4, %s638_s27 }
  0x18   : > { %p418_p4 = por %p417_p3, %p416_p2 }
  0x19   : > { %p414_p1 = pneg %p413_p0 }
  0x1a   : > { %p420_p6 = por %p419_p5, %p418_p4 }
  0x1c   : > { %p421_p8 = pnand %p420_p6, %p414_p1 }
  0x1e   : > { %424 = shalt.err (!%p421_p8)
}
  0x1f   : > { %s425_s17 = scalar_lea.vmem %s648_s29, 128  ;;  %s556_s18 = smov [#allocation2]  }
  0x20   : > { %p426_p12 = scmp.ne.s32.totalorder %s648_s29, %s425_s17  ;;  %s430_s19 = sshll.u32 %s556_s18, 4  ;;  %s431_s19 = int_to_ptr.vmem [resolvable:$false] %s430_s19 }
  0x21   : > { %s432_s25 = scalar_lea.vmem %s431_s19, 256  ;;  %p433_p11 = scmp.lt.s32.totalorder %s648_s29, %s431_s19 }
  0x22   : > { %p428_p0 = pnand %p426_p12, %p412_p13  ;;  %p434_p2 = scmp.lt.s32.totalorder %s432_s25, %s425_s17 }
  0x24   : > { %p429_p10 = pneg %p428_p0  ;;  %p435_p3 = por %p434_p2, %p433_p11 }
  0x26   : > { %p436_p4 = pnand %p435_p3, %p429_p10 }
  0x28   : > { %439 = shalt.err (!%p436_p4)
}
  0x29   : > { %353 = dma.hbm_to_vmem [thread:$0]  (!%p644_p9), %s638_s27, 128, %s648_s29, %s136_s3  }
  0x2a   : > { %p780_p1 = scmp.lt.s32.totalorder %s554_s14, 3  ;;  %p781_p5 = scmp.ge.s32.totalorder %s554_s14, 1 }
  0x2b   : > { %s691_s5 = scalar_lea.hbm %s774_s1, %s331_s23  ;;  %s159_s6 = scalar_lea.vmem [#allocation5], %s330_s24 }
  0x2c   : > { %p682_p6 = pnand %p781_p5, %p780_p1  ;;  %s168_s7 = sshll.u32 %s159_s6, 4  ;;  %s169_s7 = int_to_ptr.vmem [resolvable:$true] %s168_s7 }
  0x2d   : > { %s156_s27 = scalar_lea.sflag [#allocation6], %s629_s22  ;;  %s440_s29 = scalar_lea.hbm %s691_s5, 128 }
  0x2e   : > { %s782_s26 = scalar_select %p682_p6, 1, 0 }
  0x2f   : > { %p441_p10 = scmp.ne.s32.totalorder %s691_s5, %s440_s29  ;;  %s445_s23 = scalar_lea.hbm %s774_s1, 256 }
  0x30   : > { %p446_p12 = scmp.lt.u32.totalorder %s691_s5, %s774_s1  ;;  %p447_p0 = scmp.lt.u32.totalorder %s445_s23, %s440_s29 }
  0x31   : > { %p443_p11 = pnand %p441_p10, %p412_p13  ;;  %p449_p3 = scmp.lt.u32.totalorder %s440_s29, %s691_s5 }
  0x32   : > { %p448_p2 = por %p447_p0, %p446_p12 }
  0x33   : > { %p444_p8 = pneg %p443_p11 }
  0x34   : > { %p450_p4 = por %p449_p3, %p448_p2 }
  0x36   : > { %p451_p1 = pnand %p450_p4, %p444_p8 }
  0x38   : > { %454 = shalt.err (!%p451_p1)
}
  0x39   : > { %s455_s22 = scalar_lea.vmem %s169_s7, 128  ;;  %s557_s24 = smov [#allocation5]  }
  0x3a   : > { %p456_p5 = scmp.ne.s32.totalorder %s169_s7, %s455_s22  ;;  %s460_s18 = sshll.u32 %s557_s24, 4  ;;  %s461_s18 = int_to_ptr.vmem [resolvable:$false] %s460_s18 }
  0x3b   : > { %s462_s19 = scalar_lea.vmem %s461_s18, 256  ;;  %p463_p7 = scmp.lt.s32.totalorder %s169_s7, %s461_s18 }
  0x3c   : > { %p458_p10 = pnand %p456_p5, %p412_p13  ;;  %p464_p6 = scmp.lt.s32.totalorder %s462_s19, %s455_s22 }
  0x3e   : > { %p459_p11 = pneg %p458_p10  ;;  %p465_p0 = por %p464_p6, %p463_p7 }
  0x40   : > { %p466_p12 = pnand %p465_p0, %p459_p11 }
  0x42   : > { %469 = shalt.err (!%p466_p12)
}
  0x43   : > { %356 = dma.hbm_to_vmem [thread:$0]  (!%p644_p9), %s691_s5, 128, %s169_s7, %s156_s27  }
  0x44   : > { %p783_p8 = scmp.ne.s32.totalorder %s782_s26, 0 }
  0x45   : > { %s179_s25 = sand.u32 (!%p783_p8), 1, %s538_s10   ;;  %p784_p13 = scmp.ne.s32.totalorder (!%p783_p8), %s778_s20, 0 }
  0x46   : > { %177 = sbr.rel (%p783_p8) target bundleno = 114 (0x72), region = 28  ;;  %s335_s28 = sshll.u32 (!%p783_p8), %s179_s25, 3 }
  0x47   : > { %s180_s4 = scalar_lea.sflag (!%p783_p8), [#allocation3], %s179_s25  ;;  %s183_s6 = scalar_lea.vmem (!%p783_p8), [#allocation2], %s335_s28 }
  0x4d   : > { %521 = dma.done.wait (%p784_p13), %s180_s4, 128  }
  0x4e   : > { %523 = vsyncadd (%p784_p13), %s180_s4, 4294967168  ;;  %s189_s29 = scalar_lea.sflag [#allocation6], %s179_s25  ;;  %s192_s3 = scalar_lea.vmem [#allocation5], %s335_s28 }
  0x4f   : > { %525 = dma.done.wait (%p784_p13), %s189_s29, 128  }
  0x50   : > { %527 = vsyncadd (%p784_p13), %s189_s29, 4294967168  ;;  %p337_p7 = scmp.ne.s32.totalorder %s546_s12, 0 }
  0x51   : > { %v558_v0 = vmov (!%p337_p7), 0.0  }
  0x52   : > { %220 = sbr.rel (%p337_p7) target bundleno = 89 (0x59), region = 40  ;;  %221 = vst [vmem:[#allocation7] sm:$0xff] (!%p337_p7), %v558_v0 }
  0x59 PF: > { %v222_v1 = vld [vmem:[%s183_s6] sm:$0xff]  ;;  %v223_v2 = vld [vmem:[%s192_s3] sm:$0xff]  ;;  %s559_s30 = smov [#allocation7]   ;;  %p729_p9 = scmp.eq.s32.totalorder %s327_s15, 1 }
  0x5a   : > { %v224_v3 = vsub.f32 %v222_v1, %v223_v2  ;;  %v227_v4 = vld [vmem:[#allocation7] sm:$0xff]  ;;  %s239_s26 = sshll.u32 %s559_s30, 4  ;;  %s240_s26 = int_to_ptr.vmem [resolvable:$true] %s239_s26 }
  0x5b   : > { %s470_s12 = scalar_lea.vmem %s240_s26, 128  ;;  %p477_p4 = scmp.lt.s32.totalorder %s240_s26, %s240_s26 }
  0x5c   : > { %v225_v5 = vmul.f32 %v224_v3, %v224_v3  ;;  %p471_p6 = scmp.ne.s32.totalorder %s240_s26, %s470_s12  ;;  %p478_p1 = scmp.lt.s32.totalorder %s470_s12, %s470_s12 }
  0x5e   : > { %v228_v6 = vadd.f32 %v227_v4, %v225_v5  ;;  %p472_p2 = pnand %p471_p6, %p729_p9  ;;  %p479_p5 = por %p478_p1, %p477_p4 }
  0x60   : > { %229 = vst [vmem:[#allocation7] sm:$0xff] %v228_v6  ;;  %p473_p3 = pneg %p472_p2 }
  0x62   : > { %p480_p10 = pnand %p479_p5, %p473_p3 }
  0x64   : > { %483 = shalt.err (!%p480_p10)
}
  0x65   : > { %s484_s15 = scalar_lea.hbm %s775_s2, 128 }
  0x66   : > { %p485_p11 = scmp.ne.s32.totalorder %s775_s2, %s484_s15  ;;  %p490_p8 = scmp.lt.u32.totalorder %s484_s15, %s775_s2 }
  0x68   : > { %p486_p0 = pnand %p485_p11, %p729_p9 }
  0x6a   : > { %p487_p12 = pneg %p486_p0 }
  0x6c   : > { %p492_p13 = pnand %p490_p8, %p487_p12 }
  0x6e   : > { %495 = shalt.err (!%p492_p13)
}
  0x6f   : > { %347 = dma.vmem_to_hbm [thread:$0]  (%p729_p9), %s240_s26, 128, %s775_s2, [#allocation4]  }
  0x70   : > { %529 = dma.done.wait (%p729_p9), [#allocation4], 128  }
  0x71   : > { %531 = vsyncadd (%p729_p9), [#allocation4], 4294967168 }
  0x72 PF: > { %s19_s14 = sadd.s32 1, %s554_s14   ;;  %s786_s9 = smov %s538_s10 }
  0x73   : > { %p16_p7 = scmp.ge.s32.totalorder %s19_s14, 4   ;;  %s787_s10 = smov %s542_s11 }
  0x74   : > { %s788_s11 = smov %s626_s21  ;;  %s789_s12 = smov %s550_s13 }
  0x75   : > { %s790_s13 = smov %s792_s16  ;;  %18 = sbr.rel (!%p16_p7) target bundleno = 7 (0x7), region = 83 }
  0x7c   :  { %252 = vsyncpa [#allocation3], 1 }
  0x7d   :  { %254 = vsyncpa [#allocation3 + $0x1], 1 }
  0x7e   :  { %255 = vsyncpa [#allocation6], 1 }
  0x7f   :  { %257 = vsyncpa [#allocation6 + $0x1], 1 }
  0x80   :  { %258 = vsyncpa [#allocation4], 1 }
  0x81   :  { %260 = vsyncpa [#allocation4 + $0x1], 1 }

</bundles_post_ra>
